<compile_context>
chip_gen: v7x
topology: tpu7x:2x2x1
jax: 0.10.0
libtpu: 0.0.40
codegen_flags: <defaults>
</compile_context>

<pallas_src>
import math

import jax
import jax.numpy as jnp
from jax.experimental import pallas as pl
from jax.experimental.pallas import tpu as pltpu


def _mlp_matmul_kernel(x_ref, w_ref, y_ref, acc_ref):
    # x_ref: (tm, tk), w_ref: (tn, tk), y_ref: (tm, tn), acc_ref: (tm, tn) f32.
    k = pl.program_id(2)

    @pl.when(k == 0)
    def _():
        acc_ref[...] = jnp.zeros_like(acc_ref)

    # Contract on K (axis 1 of both operands): y[m, n] += sum_k x[m, k] * W[n, k]
    # i.e. x @ W.T without ever materializing the transpose.
    acc_ref[...] += jax.lax.dot_general(
        x_ref[...],
        w_ref[...],
        dimension_numbers=(((1,), (1,)), ((), ())),
        preferred_element_type=jnp.float32,
    )

    @pl.when(k == pl.num_programs(2) - 1)
    def _():
        y_ref[...] = acc_ref[...].astype(y_ref.dtype)


def _pick_m_tile(M, target=256):
    # Full dim is always a legal block; otherwise an 8-aligned target tile.
    return M if M <= target else target


def _pick_n_tile(N, target=256):
    # Lane-dense: a multiple of 128 when tiled, else the full N.
    return N if N <= target else target


def _pick_k_tile(K, target=512):
    # The reduction dim must be covered exactly (no padded garbage folded into
    # the accumulator), so pick a 128-multiple divisor of K, else use full K.
    if K <= target:
        return K
    for tk in range(target, 0, -128):
        if K % tk == 0:
            return tk
    return K


def mlp_forward(x, W):
    """Computes x @ W.T with a Pallas TPU kernel.

    x: (batch, in_features)
    W: (out_features, in_features)   (PyTorch nn.Linear-style weight)
    returns: (batch, out_features)
    """
    M, K = x.shape
    N, K_w = W.shape
    assert K == K_w, f"Wrong x size: in_features mismatch {K} vs {K_w}"

    tm = _pick_m_tile(M)
    tn = _pick_n_tile(N)
    tk = _pick_k_tile(K)

    grid = (pl.cdiv(M, tm), pl.cdiv(N, tn), K // tk)

    itemsize = jnp.dtype(x.dtype).itemsize
    # Per-step VMEM: double-buffered x / W / y tiles + resident f32 accumulator.
    vmem_need = 2 * itemsize * (tm * tk + tn * tk + tm * tn) + 4 * tm * tn
    vmem_limit = min(max(2 * vmem_need, 16 * 1024 * 1024), 48 * 1024 * 1024)

    cost = pl.CostEstimate(
        flops=2 * M * N * K,
        transcendentals=0,
        bytes_accessed=(M * K + K * N + M * N) * itemsize,
    )

    return pl.pallas_call(
        _mlp_matmul_kernel,
        out_shape=jax.ShapeDtypeStruct((M, N), x.dtype),
        grid_spec=pltpu.PrefetchScalarGridSpec(
            num_scalar_prefetch=0,
            grid=grid,
            in_specs=[
                # x tile: (tm, tk) — follows the M and K grid axes.
                pl.BlockSpec((tm, tk), lambda i, j, k: (i, k)),
                # W tile: (tn, tk) — no transpose; K contraction is in-kernel.
                pl.BlockSpec((tn, tk), lambda i, j, k: (j, k)),
            ],
            out_specs=pl.BlockSpec((tm, tn), lambda i, j, k: (i, j)),
            scratch_shapes=[pltpu.VMEM((tm, tn), jnp.float32)],
        ),
        compiler_params=pltpu.CompilerParams(
            dimension_semantics=("parallel", "parallel", "arbitrary"),
            vmem_limit_bytes=vmem_limit,
        ),
        cost_estimate=cost,
    )(x, W)


if __name__ == "__main__":
    # Small shapes consistent with the module's forward: x is (batch, in_features).
    # out_features chosen as a multiple of 128 so the output store is lane-dense.
    batch = 8
    in_features = 32
    out_features = 128

    key = jax.random.PRNGKey(0)
    kx, kw = jax.random.split(key)

    # Deterministic parameter init matching the PyTorch module:
    #   bound = sqrt(1 / in_features);  W = -2*bound*rand(out, in) + bound
    bound = math.sqrt(1.0 / in_features)
    W = (-2.0 * bound) * jax.random.uniform(
        kw, (out_features, in_features), dtype=jnp.float32
    ) + bound

    x = jax.random.normal(kx, (batch, in_features), dtype=jnp.float32)

    y = mlp_forward(x, W)
    jax.block_until_ready(y)

    # Cross-check against plain JAX reference.
    y_ref = x @ W.T
    assert y.shape == (batch, out_features)
    assert jnp.allclose(y, y_ref, atol=1e-5, rtol=1e-5)

    print("KERNEL_OK")
</pallas_src>

<mosaic_0001>
module attributes {stable_mosaic.version = 11 : i64} {
  func.func @_mlp_matmul_kernel(%arg0: i32, %arg1: i32, %arg2: i32, %arg3: memref<8x32xf32, #tpu.memory_space<vmem>>, %arg4: memref<128x32xf32, #tpu.memory_space<vmem>>, %arg5: memref<8x128xf32, #tpu.memory_space<vmem>>, %arg6: memref<8x128xf32, #tpu.memory_space<vmem>>) attributes {dimension_semantics = [#tpu.dimension_semantics<parallel>, #tpu.dimension_semantics<parallel>, #tpu.dimension_semantics<arbitrary>], iteration_bounds = array<i64: 1, 1, 1>, scalar_prefetch = 0 : i64, scratch_operands = 1 : i64, tpu.core_type = #tpu.core_type<tc>, window_params = [{transform_indices = @transform_0, window_bounds = array<i64: 8, 32>}, {transform_indices = @transform_1, window_bounds = array<i64: 128, 32>}, {transform_indices = @transform_2, window_bounds = array<i64: 8, 128>}]} {
    %c0_i32 = arith.constant 0 : i32
    %0 = arith.cmpi eq, %arg2, %c0_i32 : i32
    %1 = arith.extui %0 : i1 to i32
    %c0_i32_0 = arith.constant 0 : i32
    %2 = arith.cmpi ne, %1, %c0_i32_0 : i32
    scf.if %2 {
      %cst_10 = arith.constant 0.000000e+00 : f32
      %12 = vector.broadcast %cst_10 : f32 to vector<8x128xf32>
      %c0_11 = arith.constant 0 : index
      %c0_12 = arith.constant 0 : index
      %13 = vector.load %arg6[%c0_11, %c0_12] : memref<8x128xf32, #tpu.memory_space<vmem>>, vector<8x128xf32>
      tpu.vector_store %arg6[%c0_11, %c0_12], %12 {strides = array<i32>} : memref<8x128xf32, #tpu.memory_space<vmem>>, vector<8x128xf32>,
    } else {
    }
    %c0 = arith.constant 0 : index
    %c0_1 = arith.constant 0 : index
    %3 = vector.load %arg6[%c0, %c0_1] : memref<8x128xf32, #tpu.memory_space<vmem>>, vector<8x128xf32>
    %c0_2 = arith.constant 0 : index
    %c0_3 = arith.constant 0 : index
    %4 = vector.load %arg3[%c0_2, %c0_3] : memref<8x32xf32, #tpu.memory_space<vmem>>, vector<8x32xf32>
    %c0_4 = arith.constant 0 : index
    %c0_5 = arith.constant 0 : index
    %5 = vector.load %arg4[%c0_4, %c0_5] : memref<128x32xf32, #tpu.memory_space<vmem>>, vector<128x32xf32>
    %cst = arith.constant dense<0.000000e+00> : vector<8x128xf32>
    %6 = tpu.matmul %4, %5, %cst {dimension_numbers = #tpu.dot_dimension_numbers<[1], [1], [0], [0], [0, 0, 1, 0], [], []>} : vector<8x32xf32>, vector<128x32xf32>, vector<8x128xf32> -> vector<8x128xf32>
    %7 = arith.addf %3, %6 : vector<8x128xf32>
    %c0_6 = arith.constant 0 : index
    %c0_7 = arith.constant 0 : index
    %8 = vector.load %arg6[%c0_6, %c0_7] : memref<8x128xf32, #tpu.memory_space<vmem>>, vector<8x128xf32>
    tpu.vector_store %arg6[%c0_6, %c0_7], %7 {strides = array<i32>} : memref<8x128xf32, #tpu.memory_space<vmem>>, vector<8x128xf32>,
    %c0_i32_8 = arith.constant 0 : i32
    %9 = arith.cmpi eq, %arg2, %c0_i32_8 : i32
    %10 = arith.extui %9 : i1 to i32
    %c0_i32_9 = arith.constant 0 : i32
    %11 = arith.cmpi ne, %10, %c0_i32_9 : i32
    scf.if %11 {
      %c0_10 = arith.constant 0 : index
      %c0_11 = arith.constant 0 : index
      %12 = vector.load %arg6[%c0_10, %c0_11] : memref<8x128xf32, #tpu.memory_space<vmem>>, vector<8x128xf32>
      %c0_12 = arith.constant 0 : index
      %c0_13 = arith.constant 0 : index
      %13 = vector.load %arg5[%c0_12, %c0_13] : memref<8x128xf32, #tpu.memory_space<vmem>>, vector<8x128xf32>
      tpu.vector_store %arg5[%c0_12, %c0_13], %12 {strides = array<i32>} : memref<8x128xf32, #tpu.memory_space<vmem>>, vector<8x128xf32>,
    } else {
    }
    return
  }
  func.func @transform_0(%arg0: i32, %arg1: i32, %arg2: i32) -> (i32, i32) {
    %c0_i32 = arith.constant 0 : i32
    return %arg0, %arg2 : i32, i32
  }
  func.func @transform_1(%arg0: i32, %arg1: i32, %arg2: i32) -> (i32, i32) {
    %c0_i32 = arith.constant 0 : i32
    return %arg1, %arg2 : i32, i32
  }
  func.func @transform_2(%arg0: i32, %arg1: i32, %arg2: i32) -> (i32, i32) {
    %c0_i32 = arith.constant 0 : i32
    return %arg0, %arg1 : i32, i32
  }
}

</mosaic_0001>

<bundles_post_ra>
// kernel: tpu_custom_call.1
= control target key start
LH: loop header
LB: loop body
LE: loop exit
PB: predicated region body
PF: predicated region fallthrough
CT: control target
= control target key end

     0   :  { %vm35_vm0 = vcmask 261120   ;;  %v307_v2 = vmov 0.0|0.0   ;;  %vm308_vm2 = vmmov 0   ;;  %v309_v5 = vmov 0.0   ;;  %s412_s0 = inlined_call_operand.vmem [shape: f32[8,32], index: 0, kind: input, shape index: {}]   ;;  %s413_s1 = inlined_call_operand.vmem [shape: f32[128,32], index: 1, kind: input, shape index: {}]   ;;  %s414_s2 = inlined_call_operand.hbm [shape: f32[8,128], index: 2, kind: output, shape index: {}]  }
   0x1   :  { %v19_v0 = vld [vmem:[%s413_s1] sm:$0xff]  ;;  %v20_v1 = vld [vmem:[%s413_s1 + $0x8] sm:$0xff]  ;;  %247 = vmatprep.subr.bf16.mxu0 %v307_v2  ;;  %vm334_vm1 = vmpackc.low %vm35_vm0, %vm35_vm0  ;;  %244 = vmatprep.mubr.msk.f32.mxu0 %vm308_vm2, %v309_v5 }
   0x2   :  { %v248_v3 = vpack.c.bf16 %v20_v1, %v19_v0  ;;  %v21_v6 = vld [vmem:[%s413_s1 + $0x10] sm:$0xff]  ;;  %v22_v7 = vld [vmem:[%s413_s1 + $0x18] sm:$0xff] }
   0x4   :  { %250 = vmatpush3.bf16.xpose.msk.msra.mxu0 %vm334_vm1, %v248_v3 }
   0x5   :  { %251 = vmatprep.subr.bf16.mxu0 %v307_v2 }
   0x6   :  { %7 = vsyncpa [#allocation4], 0  ;;  %v252_v8 = vpack.c.bf16 %v22_v7, %v21_v6  ;;  %v23_v9 = vld [vmem:[%s413_s1 + $0x20] sm:$0xff]  ;;  %v24_v10 = vld [vmem:[%s413_s1 + $0x28] sm:$0xff]  ;;  %s310_s15 = smov [#allocation3]  }
   0x7   :  { %v256_v11 = vpack.c.bf16 %v24_v10, %v23_v9  ;;  %v25_v12 = vld [vmem:[%s413_s1 + $0x30] sm:$0xff]  ;;  %v26_v13 = vld [vmem:[%s413_s1 + $0x38] sm:$0xff]  ;;  %v27_v15 = vld [vmem:[%s413_s1 + $0x40] sm:$0xff]  ;;  %s170_s16 = sshll.u32 %s310_s15, 4  ;;  %s171_s16 = int_to_ptr.vmem [resolvable:$true] %s170_s16 }
   0x8   :  { %v260_v14 = vpack.c.bf16 %v26_v13, %v25_v12  ;;  %v28_v16 = vld [vmem:[%s413_s1 + $0x48] sm:$0xff]  ;;  %v29_v18 = vld [vmem:[%s413_s1 + $0x50] sm:$0xff]  ;;  %v30_v19 = vld [vmem:[%s413_s1 + $0x58] sm:$0xff]  ;;  %s283_s17 = scalar_lea.vmem %s171_s16, 128  ;;  %p288_p1 = scmp.lt.s32.totalorder %s171_s16, %s171_s16 }
   0x9   :  { %v264_v17 = vpack.c.bf16 %v28_v16, %v27_v15  ;;  %v268_v20 = vpack.c.bf16 %v30_v19, %v29_v18  ;;  %v31_v21 = vld [vmem:[%s413_s1 + $0x60] sm:$0xff]  ;;  %v32_v22 = vld [vmem:[%s413_s1 + $0x68] sm:$0xff]  ;;  %v33_v24 = vld [vmem:[%s413_s1 + $0x70] sm:$0xff]  ;;  %p284_p0 = scmp.ne.s32.totalorder %s171_s16, %s283_s17  ;;  %p289_p2 = scmp.lt.s32.totalorder %s283_s17, %s283_s17 }
   0xa   :  { %v272_v23 = vpack.c.bf16 %v32_v22, %v31_v21  ;;  %v34_v25 = vld [vmem:[%s413_s1 + $0x78] sm:$0xff]  ;;  %v18_v27 = vld [vmem:[%s412_s0] sm:$0xff] }
   0xb   :  { %v276_v26 = vpack.c.bf16 %v34_v25, %v33_v24  ;;  %p290_p3 = por %p289_p2, %p288_p1 }
   0xc   :  { %254 = vmatpush3.bf16.xpose.msk.msra.mxu0 %vm334_vm1, %v252_v8 }
   0xd   :  { %255 = vmatprep.subr.bf16.mxu0 %v307_v2  ;;  %p291_p4 = pnand %p290_p3, %p284_p0 }
  0x14   :  { %258 = vmatpush3.bf16.xpose.msk.msra.mxu0 %vm334_vm1, %v256_v11 }
  0x15   :  { %259 = vmatprep.subr.bf16.mxu0 %v307_v2 }
  0x1c   :  { %262 = vmatpush3.bf16.xpose.msk.msra.mxu0 %vm334_vm1, %v260_v14 }
  0x1d   :  { %263 = vmatprep.subr.bf16.mxu0 %v307_v2 }
  0x24   :  { %266 = vmatpush3.bf16.xpose.msk.msra.mxu0 %vm334_vm1, %v264_v17 }
  0x25   :  { %267 = vmatprep.subr.bf16.mxu0 %v307_v2 }
  0x2c   :  { %270 = vmatpush3.bf16.xpose.msk.msra.mxu0 %vm334_vm1, %v268_v20 }
  0x2d   :  { %271 = vmatprep.subr.bf16.mxu0 %v307_v2 }
  0x34   :  { %274 = vmatpush3.bf16.xpose.msk.msra.mxu0 %vm334_vm1, %v272_v23 }
  0x35   :  { %275 = vmatprep.subr.bf16.mxu0 %v307_v2 }
  0x3c   :  { %278 = vmatpush3.bf16.xpose.msk.msra.mxu0 %vm334_vm1, %v276_v26 }
  0x43   :  { %245 = vmatmul.mubr.msk.f32.vlgmr.msra.gmra.mrb[0].mxu0 %vm35_vm0, %v18_v27 }
 0x116   :  { %v153_v28 = vpop.f32.mrb[0].mxu0 }
 0x117   :  { %163 = vst [vmem:[#allocation3] sm:$0xff] %v153_v28  ;;  %v246_v29 = vpop.f32.mrb[1].mxu0 }
 0x118   :  { %294 = shalt.err (!%p291_p4)
}
 0x119   :  { %s295_s19 = scalar_lea.hbm %s414_s2, 128 }
 0x11a   :  { %p296_p5 = scmp.ne.s32.totalorder %s414_s2, %s295_s19  ;;  %p299_p6 = scmp.lt.u32.totalorder %s295_s19, %s414_s2 }
 0x11c   :  { %p301_p7 = pnand %p299_p6, %p296_p5 }
 0x11e   :  { %304 = shalt.err (!%p301_p7)
}
 0x11f   :  { %173 = dma.vmem_to_hbm [thread:$0]  %s171_s16, 128, %s414_s2, [#allocation4]  }
 0x120   :  { %305 = dma.done.wait [#allocation4], 128  }
 0x121   :  { %306 = vsyncadd [#allocation4], 4294967168 }
 0x122   :  { %177 = vsyncpa [#allocation4], 1 }

</bundles_post_ra>
